<compile_context>
chip_gen: v7x
topology: tpu7x:2x2x1
jax: 0.10.0
libtpu: 0.0.40
codegen_flags: <defaults>
</compile_context>

<pallas_src>
import jax
import jax.numpy as jnp
from jax.experimental import pallas as pl
from jax.experimental.pallas import tpu as pltpu


# ----------------------------- helpers -------------------------------------

def _round_up(x, m):
    return (x + m - 1) // m * m


def _pick_tile(m, block_m):
    """Largest row tile that's a multiple of 8 and <= block_m; pad rows if needed."""
    if m <= block_m:
        tm = _round_up(m, 8)
        return tm, tm
    for tm in range(block_m, 7, -8):
        if m % tm == 0:
            return tm, m
    return block_m, _round_up(m, block_m)


# ----------------------------- kernels -------------------------------------

def _mm_bias_relu_kernel(x_ref, w_ref, b_ref, feat_ref, act_ref):
    # x: (tm, K)  w: (K, N)  b: (1, N)
    acc = jnp.dot(x_ref[...], w_ref[...], preferred_element_type=jnp.float32)
    acc = acc + b_ref[...]
    feat_ref[...] = acc.astype(feat_ref.dtype)
    act_ref[...] = jnp.maximum(acc, 0.0).astype(act_ref.dtype)


def _fc_log_softmax_kernel(x_ref, w_ref, b_ref, o_ref):
    z = jnp.dot(x_ref[...], w_ref[...], preferred_element_type=jnp.float32)
    z = z + b_ref[...]
    m = jnp.max(z, axis=-1, keepdims=True)
    s = z - m
    lse = jnp.log(jnp.sum(jnp.exp(s), axis=-1, keepdims=True))
    o_ref[...] = (s - lse).astype(o_ref.dtype)


# ----------------------------- wrappers ------------------------------------

def matmul_bias_relu(x, w, b, *, block_m=256):
    """y = x @ w + b ; returns (y, relu(y)). x:(M,K) w:(K,N) b:(N,)."""
    M, K = x.shape
    Kw, N = w.shape
    assert K == Kw, (K, Kw)
    tm, Mp = _pick_tile(M, block_m)
    xp = x if Mp == M else jnp.pad(x, ((0, Mp - M), (0, 0)))
    b2 = b.reshape(1, N).astype(jnp.float32)

    feat, act = pl.pallas_call(
        _mm_bias_relu_kernel,
        out_shape=(jax.ShapeDtypeStruct((Mp, N), jnp.float32),
                   jax.ShapeDtypeStruct((Mp, N), jnp.float32)),
        grid_spec=pltpu.PrefetchScalarGridSpec(
            num_scalar_prefetch=0,
            grid=(Mp // tm,),
            in_specs=[
                pl.BlockSpec((tm, K), lambda i: (i, 0)),
                pl.BlockSpec((K, N), lambda i: (0, 0)),   # resident weights
                pl.BlockSpec((1, N), lambda i: (0, 0)),   # resident bias
            ],
            out_specs=[
                pl.BlockSpec((tm, N), lambda i: (i, 0)),
                pl.BlockSpec((tm, N), lambda i: (i, 0)),
            ],
        ),
        compiler_params=pltpu.CompilerParams(
            dimension_semantics=("parallel",)),
    )(xp.astype(jnp.float32), w.astype(jnp.float32), b2)

    if Mp != M:
        feat = feat[:M]
        act = act[:M]
    return feat, act


def fc_log_softmax(x, w, b):
    """log_softmax(x @ w + b, axis=-1). Small single-block kernel."""
    M, K = x.shape
    Kw, N = w.shape
    assert K == Kw, (K, Kw)
    b2 = b.reshape(1, N).astype(jnp.float32)
    return pl.pallas_call(
        _fc_log_softmax_kernel,
        out_shape=jax.ShapeDtypeStruct((M, N), jnp.float32),
        grid_spec=pltpu.PrefetchScalarGridSpec(
            num_scalar_prefetch=0,
            grid=(1,),
            in_specs=[
                pl.BlockSpec((M, K), lambda i: (0, 0)),
                pl.BlockSpec((K, N), lambda i: (0, 0)),
                pl.BlockSpec((1, N), lambda i: (0, 0)),
            ],
            out_specs=pl.BlockSpec((M, N), lambda i: (0, 0)),
        ),
    )(x.astype(jnp.float32), w.astype(jnp.float32), b2)


def _im2col(x, kh, kw):
    """x: (N, C, H, W) -> ((N*OH*OW, C*kh*kw), (N, OH, OW)); matches OIHW weight flattening."""
    N, C, H, W = x.shape
    OH, OW = H - kh + 1, W - kw + 1
    cols = []
    for i in range(kh):
        for j in range(kw):
            cols.append(x[:, :, i:i + OH, j:j + OW])       # (N, C, OH, OW)
    p = jnp.stack(cols, axis=2)                            # (N, C, kh*kw, OH, OW)
    p = p.transpose(0, 3, 4, 1, 2)                         # (N, OH, OW, C, kh*kw)
    return p.reshape(N * OH * OW, C * kh * kw), (N, OH, OW)


def conv2d_bias_relu(x, w, b, *, block_m=256):
    """Stride-1 VALID conv (PyTorch nn.Conv2d, no padding) via im2col + Pallas matmul.
    x: (N, C_in, H, W); w: (C_out, C_in, kh, kw); b: (C_out,).
    Returns (pre-activation NCHW, relu NCHW)."""
    C_out, C_in, kh, kw = w.shape
    patches, (N, OH, OW) = _im2col(x, kh, kw)
    w2 = w.reshape(C_out, C_in * kh * kw).T                # (K, C_out)
    feat, act = matmul_bias_relu(patches, w2, b, block_m=block_m)

    def to_nchw(y):
        return y.reshape(N, OH, OW, C_out).transpose(0, 3, 1, 2)

    return to_nchw(feat), to_nchw(act)


def maxpool2x2(x):
    # TODO(synk): MaxPool2d(2,2) is a pure layout+reduce op; kept as a jnp reshape/max
    # in the wrapper rather than a dedicated Pallas kernel.
    N, C, H, W = x.shape
    return x.reshape(N, C, H // 2, 2, W // 2, 2).max(axis=(3, 5))


# ----------------------------- model ---------------------------------------

class CNNMnistDeepPallas:
    """Pallas-TPU forward pass matching CNNMnist_deep.forward()."""

    def __init__(self, num_classes=10, key=None):
        if key is None:
            key = jax.random.PRNGKey(0)
        ks = jax.random.split(key, 10)

        def uinit(k, shape, fan_in):
            bound = 1.0 / (fan_in ** 0.5)
            return jax.random.uniform(k, shape, jnp.float32, -bound, bound)

        self.conv1_w = uinit(ks[0], (16, 1, 5, 5), 1 * 25)
        self.conv1_b = uinit(ks[1], (16,), 1 * 25)
        self.conv2_w = uinit(ks[2], (32, 16, 5, 5), 16 * 25)
        self.conv2_b = uinit(ks[3], (32,), 16 * 25)
        self.conv3_w = uinit(ks[4], (32, 32, 5, 5), 32 * 25)
        self.conv3_b = uinit(ks[5], (32,), 32 * 25)
        self.fc1_w = uinit(ks[6], (50, 2048), 2048)
        self.fc1_b = uinit(ks[7], (50,), 2048)
        self.fc2_w = uinit(ks[8], (num_classes, 50), 50)
        self.fc2_b = uinit(ks[9], (num_classes,), 50)

    def __call__(self, x):
        f1, a1 = conv2d_bias_relu(x, self.conv1_w, self.conv1_b)     # (N,16,24,24)
        f2, a2 = conv2d_bias_relu(a1, self.conv2_w, self.conv2_b)    # (N,32,20,20)
        f3, a3 = conv2d_bias_relu(a2, self.conv3_w, self.conv3_b)    # (N,32,16,16)
        p = maxpool2x2(a3)                                           # (N,32,8,8)
        flat = p.reshape(p.shape[0], -1)                             # (N,2048)
        f4, a4 = matmul_bias_relu(flat, self.fc1_w.T, self.fc1_b)    # (N,50)
        logp = fc_log_softmax(a4, self.fc2_w.T, self.fc2_b)          # (N,num_classes)
        return logp, [f1, f2, f3, f4], 0


# ----------------------------- reference & test -----------------------------

def _reference_forward(model, x):
    hp = jax.lax.Precision.HIGHEST

    def conv(x, w, b):
        y = jax.lax.conv_general_dilated(
            x, w, window_strides=(1, 1), padding="VALID",
            dimension_numbers=("NCHW", "OIHW", "NCHW"), precision=hp)
        return y + b[None, :, None, None]

    f1 = conv(x, model.conv1_w, model.conv1_b)
    a1 = jax.nn.relu(f1)
    f2 = conv(a1, model.conv2_w, model.conv2_b)
    a2 = jax.nn.relu(f2)
    f3 = conv(a2, model.conv3_w, model.conv3_b)
    a3 = jax.nn.relu(f3)
    p = maxpool2x2(a3)
    flat = p.reshape(p.shape[0], -1)
    f4 = jnp.dot(flat, model.fc1_w.T, precision=hp) + model.fc1_b
    a4 = jax.nn.relu(f4)
    logits = jnp.dot(a4, model.fc2_w.T, precision=hp) + model.fc2_b
    return jax.nn.log_softmax(logits, axis=1), [f1, f2, f3, f4]


if __name__ == "__main__":
    key = jax.random.PRNGKey(0)
    k_x, k_p = jax.random.split(key)
    batch, num_classes = 2, 10
    # MNIST-style input: 28x28 is what fc1's 2048 = 32*8*8 implies.
    x = jax.random.normal(k_x, (batch, 1, 28, 28), dtype=jnp.float32)

    model = CNNMnistDeepPallas(num_classes=num_classes, key=k_p)
    logp, feats, zero = model(x)
    logp = jax.block_until_ready(logp)

    assert logp.shape == (batch, num_classes)
    assert feats[0].shape == (batch, 16, 24, 24)
    assert feats[1].shape == (batch, 32, 20, 20)
    assert feats[2].shape == (batch, 32, 16, 16)
    assert feats[3].shape == (batch, 50)
    assert zero == 0

    ref_logp, ref_feats = _reference_forward(model, x)
    for got, ref in zip(feats, ref_feats):
        assert jnp.allclose(got, ref, atol=1e-2, rtol=1e-2), "feature mismatch vs reference"
    assert jnp.allclose(logp, ref_logp, atol=1e-2, rtol=1e-2), "log_softmax mismatch vs reference"
    # log-probabilities must normalize to 1 per row.
    assert jnp.allclose(jax.scipy.special.logsumexp(logp, axis=1), 0.0, atol=1e-4)

    print("KERNEL_OK")
</pallas_src>

<mosaic_0001>
module attributes {stable_mosaic.version = 11 : i64} {
  func.func @_mm_bias_relu_kernel(%arg0: i32, %arg1: memref<192x25xf32, #tpu.memory_space<vmem>>, %arg2: memref<25x16xf32, #tpu.memory_space<vmem>>, %arg3: memref<1x16xf32, #tpu.memory_space<vmem>>, %arg4: memref<192x16xf32, #tpu.memory_space<vmem>>, %arg5: memref<192x16xf32, #tpu.memory_space<vmem>>) attributes {dimension_semantics = [#tpu.dimension_semantics<parallel>], iteration_bounds = array<i64: 6>, scalar_prefetch = 0 : i64, scratch_operands = 0 : i64, tpu.core_type = #tpu.core_type<tc>, window_params = [{transform_indices = @transform_0, window_bounds = array<i64: 192, 25>}, {pipeline_mode = #tpu.pipeline_mode<synchronous>, transform_indices = @transform_1, window_bounds = array<i64: 25, 16>}, {pipeline_mode = #tpu.pipeline_mode<synchronous>, transform_indices = @transform_2, window_bounds = array<i64: 1, 16>}, {transform_indices = @transform_3, window_bounds = array<i64: 192, 16>}, {transform_indices = @transform_4, window_bounds = array<i64: 192, 16>}]} {
    %c0 = arith.constant 0 : index
    %c0_0 = arith.constant 0 : index
    %0 = vector.load %arg1[%c0, %c0_0] : memref<192x25xf32, #tpu.memory_space<vmem>>, vector<192x25xf32>
    %c0_1 = arith.constant 0 : index
    %c0_2 = arith.constant 0 : index
    %1 = vector.load %arg2[%c0_1, %c0_2] : memref<25x16xf32, #tpu.memory_space<vmem>>, vector<25x16xf32>
    %cst = arith.constant dense<0.000000e+00> : vector<192x16xf32>
    %2 = tpu.matmul %0, %1, %cst {dimension_numbers = #tpu.dot_dimension_numbers<[1], [0], [0], [1], [0, 0, 1, 1], [], []>} : vector<192x25xf32>, vector<25x16xf32>, vector<192x16xf32> -> vector<192x16xf32>
    %c0_3 = arith.constant 0 : index
    %c0_4 = arith.constant 0 : index
    %3 = vector.load %arg3[%c0_3, %c0_4] : memref<1x16xf32, #tpu.memory_space<vmem>>, vector<1x16xf32>
    %4 = vector.broadcast %3 : vector<1x16xf32> to vector<192x16xf32>
    %5 = arith.addf %2, %4 : vector<192x16xf32>
    %c0_5 = arith.constant 0 : index
    %c0_6 = arith.constant 0 : index
    %6 = vector.load %arg4[%c0_5, %c0_6] : memref<192x16xf32, #tpu.memory_space<vmem>>, vector<192x16xf32>
    tpu.vector_store %arg4[%c0_5, %c0_6], %5 {strides = array<i32>} : memref<192x16xf32, #tpu.memory_space<vmem>>, vector<192x16xf32>,
    %cst_7 = arith.constant 0.000000e+00 : f32
    %7 = vector.broadcast %cst_7 : f32 to vector<192x16xf32>
    %8 = arith.maximumf %5, %7 : vector<192x16xf32>
    %c0_8 = arith.constant 0 : index
    %c0_9 = arith.constant 0 : index
    %9 = vector.load %arg5[%c0_8, %c0_9] : memref<192x16xf32, #tpu.memory_space<vmem>>, vector<192x16xf32>
    tpu.vector_store %arg5[%c0_8, %c0_9], %8 {strides = array<i32>} : memref<192x16xf32, #tpu.memory_space<vmem>>, vector<192x16xf32>,
    return
  }
  func.func @transform_0(%arg0: i32) -> (i32, i32) {
    %c0_i32 = arith.constant 0 : i32
    %c0_i32_0 = arith.constant 0 : i32
    return %arg0, %c0_i32 : i32, i32
  }
  func.func @transform_1(%arg0: i32) -> (i32, i32) {
    %c0_i32 = arith.constant 0 : i32
    %c0_i32_0 = arith.constant 0 : i32
    %c0_i32_1 = arith.constant 0 : i32
    return %c0_i32, %c0_i32_0 : i32, i32
  }
  func.func @transform_2(%arg0: i32) -> (i32, i32) {
    %c0_i32 = arith.constant 0 : i32
    %c0_i32_0 = arith.constant 0 : i32
    %c0_i32_1 = arith.constant 0 : i32
    return %c0_i32, %c0_i32_0 : i32, i32
  }
  func.func @transform_3(%arg0: i32) -> (i32, i32) {
    %c0_i32 = arith.constant 0 : i32
    %c0_i32_0 = arith.constant 0 : i32
    return %arg0, %c0_i32 : i32, i32
  }
  func.func @transform_4(%arg0: i32) -> (i32, i32) {
    %c0_i32 = arith.constant 0 : i32
    %c0_i32_0 = arith.constant 0 : i32
    return %arg0, %c0_i32 : i32, i32
  }
}

</mosaic_0001>

<bundles_post_ra>
// kernel: tpu_custom_call.1
= control target key start
LH: loop header
LB: loop body
LE: loop exit
PB: predicated region body
PF: predicated region fallthrough
CT: control target
= control target key end

     0   :  { %s840_s15 = smov 0   ;;  %s1056_s0 = inlined_call_operand.vmem [shape: f32[1152,25], index: 0, kind: input, shape index: {}]   ;;  %s1057_s1 = inlined_call_operand.vmem [shape: f32[25,16], index: 1, kind: input, shape index: {}]   ;;  %s1058_s2 = inlined_call_operand.vmem [shape: f32[1,16], index: 2, kind: input, shape index: {}]   ;;  %s1059_s3 = inlined_call_operand.vmem [shape: f32[1152,16], index: 3, kind: output, shape index: {0}]   ;;  %s1060_s4 = inlined_call_operand.vmem [shape: f32[1152,16], index: 4, kind: output, shape index: {1}]  }
   0x1 LB: > { %s675_s16 = sadd.s32 4294967295, %s812_s15   ;;  %p679_p0 = scmp.ge.s32.totalorder %s812_s15, 1  ;;  %s812_s15 = sphi %s840_s15, %s15_s15  }
   0x2   : > { %p166_p1 = scmp.lt.s32.totalorder %s812_s15, 7 }
   0x4   : > { %p167_p2 = pnand %p679_p0, %p166_p1 }
   0x5   : > { %v239_v0 = vld [vmem:[%s1057_s1] sm:$0xff] (!%p167_p2)  ;;  %v240_v1 = vld [vmem:[%s1057_s1 + $0x8] sm:$0xff] (!%p167_p2)  ;;  %v241_v2 = vld [vmem:[%s1057_s1 + $0x10] sm:$0xff] (!%p167_p2)  ;;  %vm323_vm0 = vcmask (!%p167_p2), 1040384   ;;  %s197_s23 = smul.u32 (!%p167_p2), 24, %s675_s16  ;;  %vm814_vm1 = vmmov (!%p167_p2), 1  }
   0x6   : > { %170 = sbr.rel (%p167_p2) target bundleno = 257 (0x101), region = 32  ;;  %v783_v3 = vpack.c.bf16 (!%p167_p2), %v240_v1, %v239_v0  ;;  %v242_v4 = vld [vmem:[%s1057_s1 + $0x18] sm:$0x1] (!%p167_p2)  ;;  %vm788_vm2 = vmpackc.low (!%p167_p2), %vm323_vm0, %vm814_vm1  ;;  %vm250_vm3 = vcmask (!%p167_p2), 203776   ;;  %v919_v30 = vld [vmem:[%s1058_s2] ss:$0 sm:$0xff] (!%p167_p2) }
   0x7   : > { %v787_v5 = vpack.c.bf16 (!%p167_p2), %v242_v4, %v241_v2  ;;  %p198_p3 = scmp.lt.s32.totalorder (!%p167_p2), %s197_s23, 143  ;;  %vm512_vm4 = vcmask (!%p167_p2), 130048  }
   0x8   : > { %784 = vmatprep.subr.bf16.mxu0 (!%p167_p2), %v783_v3  ;;  %793 = vmatprep.subr.bf16.mxu1 (!%p167_p2), %v783_v3 }
   0x9   : > { %786 = vmatpush3.bf16.msra.mxu0 (!%p167_p2), %v783_v3  ;;  %795 = vmatpush3.bf16.msra.mxu1 (!%p167_p2), %v783_v3 }
   0xa   : > { %789 = vmatprep.subr.msk.bf16.mxu0 (!%p167_p2), %vm788_vm2, %v787_v5  ;;  %794 = vmatprep.subr.msk.bf16.mxu1 (!%p167_p2), %vm788_vm2, %v787_v5 }
   0xd   : > { %s1062_s23 = smov (!%p198_p3, %s197_s23), 143  ;;  %792 = vmatpush3.bf16.msk.msra.mxu0 %vm788_vm2, %v787_v5  ;;  %796 = vmatpush3.bf16.msk.msra.mxu1 %vm788_vm2, %v787_v5 }
   0xe   : > { %s860_s26 = sshll.u32 %s1062_s23, 3 }
   0xf   : > { %s866_s29 = scalar_lea.vmem %s1056_s0, %s860_s26  ;;  %s925_s8 = scalar_lea.vmem %s1059_s3, %s860_s26 }
  0x10   : > { %v215_v6 = vld [vmem:[%s866_s29] sm:$0xff]  ;;  %v216_v8 = vld [vmem:[%s866_s29 + $0x8] sm:$0xff]  ;;  %v217_v10 = vld [vmem:[%s866_s29 + $0x10] sm:$0xff]  ;;  %s933_s11 = scalar_lea.vmem %s1060_s4, %s860_s26 }
  0x11   : > { %v227_v7 = vld [vmem:[%s866_s29 + $0x60] sm:$0xff]  ;;  %747 = vmatprep.mubr.msk.f32.mxu0 %vm250_vm3, %v215_v6  ;;  %v228_v9 = vld [vmem:[%s866_s29 + $0x68] sm:$0xff]  ;;  %v229_v11 = vld [vmem:[%s866_s29 + $0x70] sm:$0xff] }
  0x12   : > { %765 = vmatprep.mubr.msk.f32.mxu1 %vm250_vm3, %v227_v7  ;;  %748 = vmatmul.mubr.msk.f32.vlgmr.msra.gmra.mrb[0].mxu0 %vm250_vm3, %v216_v8  ;;  %v218_v12 = vld [vmem:[%s866_s29 + $0x18] sm:$0xff]  ;;  %v219_v14 = vld [vmem:[%s866_s29 + $0x20] sm:$0xff]  ;;  %v220_v16 = vld [vmem:[%s866_s29 + $0x28] sm:$0xff] }
  0x13   : > { %766 = vmatmul.mubr.msk.f32.vlgmr.msra.gmra.mrb[0].mxu1 %vm250_vm3, %v228_v9  ;;  %750 = vmatprep.mubr.msk.f32.mxu0 %vm250_vm3, %v217_v10  ;;  %v230_v13 = vld [vmem:[%s866_s29 + $0x78] sm:$0xff]  ;;  %v231_v15 = vld [vmem:[%s866_s29 + $0x80] sm:$0xff]  ;;  %v232_v17 = vld [vmem:[%s866_s29 + $0x88] sm:$0xff] }
  0x14   : > { %768 = vmatprep.mubr.msk.f32.mxu1 %vm250_vm3, %v229_v11  ;;  %v221_v18 = vld [vmem:[%s866_s29 + $0x30] sm:$0xff]  ;;  %v222_v20 = vld [vmem:[%s866_s29 + $0x38] sm:$0xff]  ;;  %v223_v22 = vld [vmem:[%s866_s29 + $0x40] sm:$0xff] }
  0x15   : > { %v233_v19 = vld [vmem:[%s866_s29 + $0x90] sm:$0xff]  ;;  %v234_v21 = vld [vmem:[%s866_s29 + $0x98] sm:$0xff]  ;;  %v235_v23 = vld [vmem:[%s866_s29 + $0xa0] sm:$0xff] }
  0x16   : > { %751 = vmatmul.mubr.msk.f32.gmra.mrb[2].mxu0 %vm250_vm3, %v218_v12  ;;  %v224_v24 = vld [vmem:[%s866_s29 + $0x48] sm:$0xff]  ;;  %v225_v26 = vld [vmem:[%s866_s29 + $0x50] sm:$0xff]  ;;  %v226_v28 = vld [vmem:[%s866_s29 + $0x58] sm:$0xff] }
  0x17   : > { %769 = vmatmul.mubr.msk.f32.gmra.mrb[2].mxu1 %vm250_vm3, %v230_v13  ;;  %753 = vmatprep.mubr.msk.f32.mxu0 %vm250_vm3, %v219_v14  ;;  %v236_v25 = vld [vmem:[%s866_s29 + $0xa8] sm:$0xff]  ;;  %v237_v27 = vld [vmem:[%s866_s29 + $0xb0] sm:$0xff]  ;;  %v238_v29 = vld [vmem:[%s866_s29 + $0xb8] sm:$0xff] }
  0x18   : > { %771 = vmatprep.mubr.msk.f32.mxu1 %vm250_vm3, %v231_v15 }
  0x1a   : > { %754 = vmatmul.mubr.msk.f32.gmra.mrb[4].mxu0 %vm250_vm3, %v220_v16 }
  0x1b   : > { %772 = vmatmul.mubr.msk.f32.gmra.mrb[4].mxu1 %vm250_vm3, %v232_v17  ;;  %756 = vmatprep.mubr.msk.f32.mxu0 %vm250_vm3, %v221_v18 }
  0x1c   : > { %774 = vmatprep.mubr.msk.f32.mxu1 %vm250_vm3, %v233_v19 }
  0x1e   : > { %757 = vmatmul.mubr.msk.f32.gmra.mrb[6].mxu0 %vm250_vm3, %v222_v20 }
  0x1f   : > { %775 = vmatmul.mubr.msk.f32.gmra.mrb[6].mxu1 %vm250_vm3, %v234_v21  ;;  %759 = vmatprep.mubr.msk.f32.mxu0 %vm250_vm3, %v223_v22 }
  0x20   : > { %777 = vmatprep.mubr.msk.f32.mxu1 %vm250_vm3, %v235_v23 }
  0x22   : > { %760 = vmatmul.mubr.msk.f32.gmra.mrb[8].mxu0 %vm250_vm3, %v224_v24 }
  0x23   : > { %778 = vmatmul.mubr.msk.f32.gmra.mrb[8].mxu1 %vm250_vm3, %v236_v25  ;;  %762 = vmatprep.mubr.msk.f32.mxu0 %vm250_vm3, %v225_v26 }
  0x24   : > { %780 = vmatprep.mubr.msk.f32.mxu1 %vm250_vm3, %v237_v27 }
  0x26   : > { %763 = vmatmul.mubr.msk.f32.gmra.mrb[10].mxu0 %vm250_vm3, %v226_v28 }
  0x27   : > { %781 = vmatmul.mubr.msk.f32.gmra.mrb[10].mxu1 %vm250_vm3, %v238_v29 }
  0xe5   : > { %v749_v31 = vpop.f32.mrb[0].mxu0 }
  0xe6   : > { %v767_v32 = vpop.f32.mrb[0].mxu1  ;;  %v399_v33 = vadd.f32 %v749_v31, %v919_v30  ;;  %v393_v35 = vpop.f32.mrb[1].mxu0 }
  0xe7   : > { %v459_v34 = vadd.f32 %v767_v32, %v919_v30  ;;  %v453_v36 = vpop.f32.mrb[1].mxu1  ;;  %v394_v37 = vadd.f32 %v919_v30, %v393_v35 }
  0xe8   : > { %v454_v38 = vadd.f32 %v919_v30, %v453_v36  ;;  %514 = vst.msk [vmem:[%s925_s8 + $0x8] sm:$0xff] %vm512_vm4, %v399_v33  ;;  %v538_v39 = vmax.f32 %v399_v33, 0.0 }
  0xe9   : > { %526 = vst.msk [vmem:[%s925_s8 + $0x68] sm:$0xff] %vm512_vm4, %v459_v34  ;;  %v550_v40 = vmax.f32 %v459_v34, 0.0  ;;  %513 = vst.msk [vmem:[%s925_s8] sm:$0xff] %vm512_vm4, %v394_v37  ;;  %v537_v41 = vmax.f32 %v394_v37, 0.0  ;;  %v752_v43 = vpop.f32.mrb[2].mxu0 }
  0xea   : > { %525 = vst.msk [vmem:[%s925_s8 + $0x60] sm:$0xff] %vm512_vm4, %v454_v38  ;;  %v549_v42 = vmax.f32 %v454_v38, 0.0  ;;  %v770_v44 = vpop.f32.mrb[2].mxu1  ;;  %562 = vst.msk [vmem:[%s933_s11 + $0x8] sm:$0xff] %vm512_vm4, %v538_v39  ;;  %v409_v45 = vadd.f32 %v752_v43, %v919_v30  ;;  %v403_v47 = vpop.f32.mrb[3].mxu0 }
  0xeb   : > { %574 = vst.msk [vmem:[%s933_s11 + $0x68] sm:$0xff] %vm512_vm4, %v550_v40  ;;  %v469_v46 = vadd.f32 %v770_v44, %v919_v30  ;;  %v463_v48 = vpop.f32.mrb[3].mxu1  ;;  %561 = vst.msk [vmem:[%s933_s11] sm:$0xff] %vm512_vm4, %v537_v41  ;;  %v404_v49 = vadd.f32 %v919_v30, %v403_v47 }
  0xec   : > { %573 = vst.msk [vmem:[%s933_s11 + $0x60] sm:$0xff] %vm512_vm4, %v549_v42  ;;  %v464_v50 = vadd.f32 %v919_v30, %v463_v48  ;;  %516 = vst.msk [vmem:[%s925_s8 + $0x18] sm:$0xff] %vm512_vm4, %v409_v45  ;;  %v540_v51 = vmax.f32 %v409_v45, 0.0 }
  0xed   : > { %528 = vst.msk [vmem:[%s925_s8 + $0x78] sm:$0xff] %vm512_vm4, %v469_v46  ;;  %v552_v52 = vmax.f32 %v469_v46, 0.0  ;;  %515 = vst.msk [vmem:[%s925_s8 + $0x10] sm:$0xff] %vm512_vm4, %v404_v49  ;;  %v539_v53 = vmax.f32 %v404_v49, 0.0  ;;  %v755_v55 = vpop.f32.mrb[4].mxu0 }
  0xee   : > { %527 = vst.msk [vmem:[%s925_s8 + $0x70] sm:$0xff] %vm512_vm4, %v464_v50  ;;  %v551_v54 = vmax.f32 %v464_v50, 0.0  ;;  %v773_v56 = vpop.f32.mrb[4].mxu1  ;;  %564 = vst.msk [vmem:[%s933_s11 + $0x18] sm:$0xff] %vm512_vm4, %v540_v51  ;;  %v419_v57 = vadd.f32 %v755_v55, %v919_v30  ;;  %v413_v59 = vpop.f32.mrb[5].mxu0 }
  0xef   : > { %576 = vst.msk [vmem:[%s933_s11 + $0x78] sm:$0xff] %vm512_vm4, %v552_v52  ;;  %v479_v58 = vadd.f32 %v773_v56, %v919_v30  ;;  %v473_v60 = vpop.f32.mrb[5].mxu1  ;;  %563 = vst.msk [vmem:[%s933_s11 + $0x10] sm:$0xff] %vm512_vm4, %v539_v53  ;;  %v414_v61 = vadd.f32 %v919_v30, %v413_v59 }
  0xf0   : > { %575 = vst.msk [vmem:[%s933_s11 + $0x70] sm:$0xff] %vm512_vm4, %v551_v54  ;;  %v474_v62 = vadd.f32 %v919_v30, %v473_v60  ;;  %518 = vst.msk [vmem:[%s925_s8 + $0x28] sm:$0xff] %vm512_vm4, %v419_v57  ;;  %v542_v63 = vmax.f32 %v419_v57, 0.0 }
  0xf1   : > { %530 = vst.msk [vmem:[%s925_s8 + $0x88] sm:$0xff] %vm512_vm4, %v479_v58  ;;  %v554_v0 = vmax.f32 %v479_v58, 0.0  ;;  %517 = vst.msk [vmem:[%s925_s8 + $0x20] sm:$0xff] %vm512_vm4, %v414_v61  ;;  %v541_v1 = vmax.f32 %v414_v61, 0.0  ;;  %v758_v3 = vpop.f32.mrb[6].mxu0 }
  0xf2   : > { %529 = vst.msk [vmem:[%s925_s8 + $0x80] sm:$0xff] %vm512_vm4, %v474_v62  ;;  %v553_v2 = vmax.f32 %v474_v62, 0.0  ;;  %v776_v4 = vpop.f32.mrb[6].mxu1  ;;  %566 = vst.msk [vmem:[%s933_s11 + $0x28] sm:$0xff] %vm512_vm4, %v542_v63  ;;  %v429_v5 = vadd.f32 %v758_v3, %v919_v30  ;;  %v423_v7 = vpop.f32.mrb[7].mxu0 }
  0xf3   : > { %578 = vst.msk [vmem:[%s933_s11 + $0x88] sm:$0xff] %vm512_vm4, %v554_v0  ;;  %v489_v6 = vadd.f32 %v776_v4, %v919_v30  ;;  %v483_v8 = vpop.f32.mrb[7].mxu1  ;;  %565 = vst.msk [vmem:[%s933_s11 + $0x20] sm:$0xff] %vm512_vm4, %v541_v1  ;;  %v424_v9 = vadd.f32 %v919_v30, %v423_v7 }
  0xf4   : > { %577 = vst.msk [vmem:[%s933_s11 + $0x80] sm:$0xff] %vm512_vm4, %v553_v2  ;;  %v484_v10 = vadd.f32 %v919_v30, %v483_v8  ;;  %520 = vst.msk [vmem:[%s925_s8 + $0x38] sm:$0xff] %vm512_vm4, %v429_v5  ;;  %v544_v11 = vmax.f32 %v429_v5, 0.0 }
  0xf5   : > { %532 = vst.msk [vmem:[%s925_s8 + $0x98] sm:$0xff] %vm512_vm4, %v489_v6  ;;  %v556_v12 = vmax.f32 %v489_v6, 0.0  ;;  %519 = vst.msk [vmem:[%s925_s8 + $0x30] sm:$0xff] %vm512_vm4, %v424_v9  ;;  %v543_v13 = vmax.f32 %v424_v9, 0.0  ;;  %v761_v15 = vpop.f32.mrb[8].mxu0 }
  0xf6   : > { %531 = vst.msk [vmem:[%s925_s8 + $0x90] sm:$0xff] %vm512_vm4, %v484_v10  ;;  %v555_v14 = vmax.f32 %v484_v10, 0.0  ;;  %v779_v16 = vpop.f32.mrb[8].mxu1  ;;  %568 = vst.msk [vmem:[%s933_s11 + $0x38] sm:$0xff] %vm512_vm4, %v544_v11  ;;  %v439_v17 = vadd.f32 %v761_v15, %v919_v30  ;;  %v433_v19 = vpop.f32.mrb[9].mxu0 }
  0xf7   : > { %580 = vst.msk [vmem:[%s933_s11 + $0x98] sm:$0xff] %vm512_vm4, %v556_v12  ;;  %v499_v18 = vadd.f32 %v779_v16, %v919_v30  ;;  %v493_v20 = vpop.f32.mrb[9].mxu1  ;;  %567 = vst.msk [vmem:[%s933_s11 + $0x30] sm:$0xff] %vm512_vm4, %v543_v13  ;;  %v434_v21 = vadd.f32 %v919_v30, %v433_v19 }
  0xf8   : > { %579 = vst.msk [vmem:[%s933_s11 + $0x90] sm:$0xff] %vm512_vm4, %v555_v14  ;;  %v494_v22 = vadd.f32 %v919_v30, %v493_v20  ;;  %522 = vst.msk [vmem:[%s925_s8 + $0x48] sm:$0xff] %vm512_vm4, %v439_v17  ;;  %v546_v23 = vmax.f32 %v439_v17, 0.0 }
  0xf9   : > { %534 = vst.msk [vmem:[%s925_s8 + $0xa8] sm:$0xff] %vm512_vm4, %v499_v18  ;;  %v558_v24 = vmax.f32 %v499_v18, 0.0  ;;  %521 = vst.msk [vmem:[%s925_s8 + $0x40] sm:$0xff] %vm512_vm4, %v434_v21  ;;  %v545_v25 = vmax.f32 %v434_v21, 0.0  ;;  %v764_v27 = vpop.f32.mrb[10].mxu0 }
  0xfa   : > { %533 = vst.msk [vmem:[%s925_s8 + $0xa0] sm:$0xff] %vm512_vm4, %v494_v22  ;;  %v557_v26 = vmax.f32 %v494_v22, 0.0  ;;  %v782_v28 = vpop.f32.mrb[10].mxu1  ;;  %570 = vst.msk [vmem:[%s933_s11 + $0x48] sm:$0xff] %vm512_vm4, %v546_v23  ;;  %v449_v29 = vadd.f32 %v764_v27, %v919_v30  ;;  %v443_v32 = vpop.f32.mrb[11].mxu0 }
  0xfb   : > { %582 = vst.msk [vmem:[%s933_s11 + $0xa8] sm:$0xff] %vm512_vm4, %v558_v24  ;;  %v509_v31 = vadd.f32 %v782_v28, %v919_v30  ;;  %v503_v33 = vpop.f32.mrb[11].mxu1  ;;  %569 = vst.msk [vmem:[%s933_s11 + $0x40] sm:$0xff] %vm512_vm4, %v545_v25  ;;  %v444_v34 = vadd.f32 %v919_v30, %v443_v32 }
  0xfc   : > { %581 = vst.msk [vmem:[%s933_s11 + $0xa0] sm:$0xff] %vm512_vm4, %v557_v26  ;;  %v504_v35 = vadd.f32 %v919_v30, %v503_v33  ;;  %524 = vst.msk [vmem:[%s925_s8 + $0x58] sm:$0xff] %vm512_vm4, %v449_v29  ;;  %v548_v36 = vmax.f32 %v449_v29, 0.0 }
  0xfd   : > { %536 = vst.msk [vmem:[%s925_s8 + $0xb8] sm:$0xff] %vm512_vm4, %v509_v31  ;;  %v560_v37 = vmax.f32 %v509_v31, 0.0  ;;  %523 = vst.msk [vmem:[%s925_s8 + $0x50] sm:$0xff] %vm512_vm4, %v444_v34  ;;  %v547_v38 = vmax.f32 %v444_v34, 0.0 }
  0xfe   : > { %535 = vst.msk [vmem:[%s925_s8 + $0xb0] sm:$0xff] %vm512_vm4, %v504_v35  ;;  %v559_v39 = vmax.f32 %v504_v35, 0.0  ;;  %572 = vst.msk [vmem:[%s933_s11 + $0x58] sm:$0xff] %vm512_vm4, %v548_v36 }
  0xff   : > { %584 = vst.msk [vmem:[%s933_s11 + $0xb8] sm:$0xff] %vm512_vm4, %v560_v37  ;;  %571 = vst.msk [vmem:[%s933_s11 + $0x50] sm:$0xff] %vm512_vm4, %v547_v38 }
 0x100   : > { %583 = vst.msk [vmem:[%s933_s11 + $0xb0] sm:$0xff] %vm512_vm4, %v559_v39 }
 0x101 PF: > { %s15_s15 = sadd.s32 1, %s812_s15  }
 0x102   : > { %p12_p4 = scmp.ge.s32.totalorder %s15_s15, 8  }
 0x104   :  { %14 = sbr.rel (!%p12_p4) target bundleno = 1 (0x1), region = 74 }

</bundles_post_ra>
